<compile_context>
chip_gen: v6e
topology: v6e:2x2x1
jax: 0.10.0
libtpu: 0.0.40
codegen_flags: <defaults>
</compile_context>

<pallas_src>
import functools

import jax
import jax.numpy as jnp
from jax.experimental import pallas as pl
from jax.experimental.pallas import tpu as pltpu

_LANE_CANDIDATES = (1024, 512, 256, 128)
_BLOCK_BYTES = 2 * 1024 * 1024  # per-buffer VMEM target (~8 MiB total, double-buffered in+out)


# ---------------- Pallas kernels (elementwise hot path) ----------------

def _relu_kernel(x_ref, o_ref):
    # max(x, 0): exact ReLU semantics (single VPU op per vreg).
    o_ref[...] = jnp.maximum(x_ref[...], jnp.zeros((), x_ref.dtype))


def _leaky_relu_kernel(x_ref, o_ref, *, slope):
    x = x_ref[...]
    o_ref[...] = jnp.where(x >= 0, x, x * jnp.asarray(slope, x.dtype))


def _scale_kernel(scale_ref, x_ref, o_ref):
    # scale_ref is a (1, 1) SMEM ref holding acti_choice[index].
    o_ref[...] = x_ref[...] * scale_ref[0, 0]


# ---------------- layout helpers ----------------

def _min_sublanes(dtype):
    itemsize = jnp.dtype(dtype).itemsize
    return max(8, 32 // itemsize)  # f32: 8, bf16: 16, int8: 32


def _pick_layout(n, dtype):
    """Return (lanes, rows, pad, block_rows) for a lane-dense 2-D slab."""
    min_sub = _min_sublanes(dtype)
    itemsize = jnp.dtype(dtype).itemsize

    lanes = None
    pad = 0
    for cand in _LANE_CANDIDATES:
        if n % cand == 0:
            lanes = cand
            break
    if lanes is None:
        # Rare fallback (element count not a multiple of 128): pad the flat
        # tail once.  Zero padding is numerically safe for every mode.
        lanes = 128
        pad = (-n) % (lanes * min_sub)
    rows = (n + pad) // lanes

    max_block_rows = max(min_sub, (_BLOCK_BYTES // itemsize) // lanes)
    max_block_rows -= max_block_rows % min_sub
    block_rows = rows if rows <= max_block_rows else max_block_rows
    return lanes, rows, pad, block_rows


# ---------------- forward implementation ----------------

@functools.partial(jax.jit, static_argnames=("mode", "slope"))
def _elementwise(x, scale, *, mode, slope=0.1):
    orig_shape = x.shape
    n = x.size
    lanes, rows, pad, block_rows = _pick_layout(n, x.dtype)

    flat = x.reshape(-1)
    if pad:
        flat = jnp.concatenate([flat, jnp.zeros((pad,), flat.dtype)])
    x2d = flat.reshape(rows, lanes)

    grid = (pl.cdiv(rows, block_rows),)
    block = pl.BlockSpec((block_rows, lanes), lambda i: (i, 0))
    out_sds = jax.ShapeDtypeStruct(x2d.shape, x2d.dtype)
    params = pltpu.CompilerParams(dimension_semantics=("parallel",))

    if mode == "relu":
        out2d = pl.pallas_call(
            _relu_kernel, out_shape=out_sds, grid=grid,
            in_specs=[block], out_specs=block, compiler_params=params,
        )(x2d)
    elif mode == "leaky_relu":
        out2d = pl.pallas_call(
            functools.partial(_leaky_relu_kernel, slope=slope),
            out_shape=out_sds, grid=grid,
            in_specs=[block], out_specs=block, compiler_params=params,
        )(x2d)
    elif mode == "scale":
        scale2d = jnp.asarray(scale, x.dtype).reshape(1, 1)
        out2d = pl.pallas_call(
            _scale_kernel, out_shape=out_sds, grid=grid,
            in_specs=[pl.BlockSpec(memory_space=pltpu.MemorySpace.SMEM), block],
            out_specs=block, compiler_params=params,
        )(scale2d, x2d)
    else:
        raise ValueError(f"unknown mode: {mode}")

    if pad:
        out2d = out2d.reshape(-1)[:n]
    return out2d.reshape(orig_shape)


def custom_relu_forward(x, index, acti_choice=None):
    """Forward pass of custom_relu.  `acti_choice` is static config."""
    if acti_choice is None:
        return _elementwise(x, None, mode="relu")
    if isinstance(acti_choice, str):
        if acti_choice == "linear":
            # Identity: skipping the Pallas call avoids a full HBM round trip.
            return x
        if acti_choice == "leaky_relu":
            return _elementwise(x, None, mode="leaky_relu")
        raise ValueError(f"unknown acti_choice: {acti_choice}")
    # acti_choice is an array of per-layer scales; gather the scalar in glue,
    # do the broadcast-multiply inside the kernel (scalar delivered via SMEM).
    scale = jnp.asarray(acti_choice)[index]
    return _elementwise(x, scale, mode="scale")


# ---------------- test ----------------

if __name__ == "__main__":
    key = jax.random.PRNGKey(0)
    kx, ks, kb, ko = jax.random.split(key, 4)

    # NCHW input, matching the PyTorch convention.
    x = jax.random.normal(kx, (2, 4, 16, 16), dtype=jnp.float32)
    index = 1

    # Mode 1: default (acti_choice=None) -> ReLU
    y_relu = custom_relu_forward(x, index, acti_choice=None)
    jax.block_until_ready(y_relu)
    assert jnp.allclose(y_relu, jnp.maximum(x, 0.0), atol=1e-6)

    # Mode 2: 'leaky_relu'
    y_lrelu = custom_relu_forward(x, index, acti_choice='leaky_relu')
    jax.block_until_ready(y_lrelu)
    assert jnp.allclose(y_lrelu, jnp.where(x >= 0, x, 0.1 * x), atol=1e-6)

    # Mode 3: 'linear' (identity, no kernel launch)
    y_lin = custom_relu_forward(x, index, acti_choice='linear')
    jax.block_until_ready(y_lin)
    assert jnp.allclose(y_lin, x, atol=1e-6)

    # Mode 4: array of scales, x * acti_choice[index]
    acti = jax.random.uniform(ks, (4,), dtype=jnp.float32) + 0.5
    y_scale = custom_relu_forward(x, index, acti_choice=acti)
    jax.block_until_ready(y_scale)
    assert jnp.allclose(y_scale, x * acti[index], atol=1e-6)

    # Extra: exercise the multi-block grid path (rows > block_rows).
    xb = jax.random.normal(kb, (8, 32, 64, 64), dtype=jnp.float32)
    yb = custom_relu_forward(xb, index, acti_choice=None)
    jax.block_until_ready(yb)
    assert jnp.allclose(yb, jnp.maximum(xb, 0.0), atol=1e-6)

    # Extra: exercise the non-128-divisible fallback (pad + slice path).
    xo = jax.random.normal(ko, (2, 3, 5, 7), dtype=jnp.float32)
    yo = custom_relu_forward(xo, index, acti_choice='leaky_relu')
    jax.block_until_ready(yo)
    assert jnp.allclose(yo, jnp.where(xo >= 0, xo, 0.1 * xo), atol=1e-6)

    print("KERNEL_OK")
</pallas_src>

<mosaic_0001>
module attributes {stable_mosaic.version = 11 : i64} {
  func.func @_relu_kernel(%arg0: i32, %arg1: memref<2x1024xf32, #tpu.memory_space<vmem>>, %arg2: memref<2x1024xf32, #tpu.memory_space<vmem>>) attributes {dimension_semantics = [#tpu.dimension_semantics<parallel>], iteration_bounds = array<i64: 1>, scalar_prefetch = 0 : i64, scratch_operands = 0 : i64, tpu.core_type = #tpu.core_type<tc>, window_params = [{transform_indices = @transform_0, window_bounds = array<i64: 2, 1024>}, {transform_indices = @transform_1, window_bounds = array<i64: 2, 1024>}]} {
    %c0 = arith.constant 0 : index
    %c0_0 = arith.constant 0 : index
    %0 = vector.load %arg1[%c0, %c0_0] : memref<2x1024xf32, #tpu.memory_space<vmem>>, vector<2x1024xf32>
    %cst = arith.constant 0.000000e+00 : f32
    %1 = vector.broadcast %cst : f32 to vector<2x1024xf32>
    %2 = arith.maximumf %0, %1 : vector<2x1024xf32>
    %c0_1 = arith.constant 0 : index
    %c0_2 = arith.constant 0 : index
    %3 = vector.load %arg2[%c0_1, %c0_2] : memref<2x1024xf32, #tpu.memory_space<vmem>>, vector<2x1024xf32>
    tpu.vector_store %arg2[%c0_1, %c0_2], %2 {strides = array<i32>} : memref<2x1024xf32, #tpu.memory_space<vmem>>, vector<2x1024xf32>,
    return
  }
  func.func @transform_0(%arg0: i32) -> (i32, i32) {
    %c0_i32 = arith.constant 0 : i32
    %c0_i32_0 = arith.constant 0 : i32
    return %arg0, %c0_i32 : i32, i32
  }
  func.func @transform_1(%arg0: i32) -> (i32, i32) {
    %c0_i32 = arith.constant 0 : i32
    %c0_i32_0 = arith.constant 0 : i32
    return %arg0, %c0_i32 : i32, i32
  }
}

</mosaic_0001>

<bundles_post_ra>
// kernel: _elementwise.1
= control target key start
LH: loop header
LB: loop body
LE: loop exit
PB: predicated region body
PF: predicated region fallthrough
CT: control target
= control target key end

     0   :  { %s40_s0 = inlined_call_operand.vmem [shape: f32[2,1024], index: 0, kind: input, shape index: {}]   ;;  %s41_s1 = inlined_call_operand.vmem [shape: f32[2,1024], index: 1, kind: output, shape index: {}]  }
   0x1   :  { %v8_v0 = vld [vmem:[%s40_s0] sm:$0xff]  ;;  %v9_v1 = vld [vmem:[%s40_s0 + $0x8] sm:$0xff] }
   0x2   :  { %v10_v2 = vmax.f32 %v8_v0, 0.0  ;;  %v11_v3 = vmax.f32 %v9_v1, 0.0 }
   0x4   :  { %12 = vst [vmem:[%s41_s1] sm:$0xff] %v10_v2  ;;  %13 = vst [vmem:[%s41_s1 + $0x8] sm:$0xff] %v11_v3 }

</bundles_post_ra>
